<compile_context>
chip_gen: v7x
topology: tpu7x:2x2x1
jax: 0.10.0
libtpu: 0.0.40
codegen_flags: <defaults>
</compile_context>

<pallas_src>
import functools
import math

import jax
import jax.numpy as jnp
from jax.experimental import pallas as pl
from jax.experimental.pallas import tpu as pltpu


def _round_up(x, m):
    return ((x + m - 1) // m) * m


def _focal_loss_kernel(pred_ref, gt_ref, out_ref, loss_acc, cnt_acc, *,
                       rows, block_rows, blocks_per_slice, needs_mask):
    c = pl.program_id(0)   # TensorCore slice axis ("parallel")
    i = pl.program_id(1)   # reduction step within the slice ("arbitrary")

    @pl.when(i == 0)
    def _init():
        loss_acc[...] = jnp.zeros_like(loss_acc)
        cnt_acc[...] = jnp.zeros_like(cnt_acc)

    # Upcast inside the kernel so bf16 heatmaps stream half the HBM bytes.
    pred = pred_ref[...].astype(jnp.float32)
    gt = gt_ref[...].astype(jnp.float32)

    if needs_mask:
        # Tail / over-covered block: zero rows past the logical end BEFORE the
        # log chain so garbage lanes can never produce NaN/Inf.
        global_block = c * blocks_per_slice + i
        row_ids = jax.lax.broadcasted_iota(jnp.int32, pred.shape, 0)
        valid = (global_block * block_rows + row_ids) < rows
        pred = jnp.where(valid, pred, 0.0)
        gt = jnp.where(valid, gt, 0.0)

    # alpha = 2, beta = 4 -> explicit VPU multiplies; the two logs are the only
    # EUP ops. Positive / negative branches fused into a single select.
    # NOTE: matches the PyTorch reference for gt in [0, 1] (gt > 1 would be
    # treated as a negative here but is excluded by gt.lt(1) in the reference).
    pos_mask = gt == 1.0
    one_m_pred = 1.0 - pred
    one_m_gt = 1.0 - gt
    t2 = one_m_gt * one_m_gt
    neg_weights = t2 * t2                               # (1 - gt)^4
    term = jnp.where(
        pos_mask,
        jnp.log(pred) * (one_m_pred * one_m_pred),
        jnp.log(one_m_pred) * (pred * pred) * neg_weights,
    )

    # Pre-reduce the block along rows with a layout-trivial (G, 8, L) split:
    # pure VALU adds into small (8, L) accumulators, no cross-lane work here.
    lane = term.shape[-1]
    loss_acc[...] += jnp.sum(term.reshape(-1, 8, lane), axis=0)
    cnt_acc[...] += jnp.sum(
        jnp.where(pos_mask, 1.0, 0.0).reshape(-1, 8, lane), axis=0)

    @pl.when(i == pl.num_programs(1) - 1)
    def _finalize():
        # One-time cross-lane reduce, then pack the two per-slice partial
        # scalars (loss sum, #pos) into a full (8, 128) slab -> single store.
        loss_sum = jnp.sum(loss_acc[...])
        num_pos = jnp.sum(cnt_acc[...])
        row_ids = jax.lax.broadcasted_iota(jnp.int32, (8, 128), 0)
        lane_ids = jax.lax.broadcasted_iota(jnp.int32, (8, 128), 1)
        slab = jnp.where(
            row_ids == 0,
            jnp.where(lane_ids == 0, loss_sum,
                      jnp.where(lane_ids == 1, num_pos, 0.0)),
            0.0)
        out_ref[...] = slab


def focal_loss(pred, gt, *, target_block_bytes=4 << 20, num_slices=2):
    """Pallas implementation of FocalLoss.forward(out, target).

    pred, gt: identically-shaped arrays (e.g. (N, C, H, W)), f32 or bf16.
    Returns a scalar f32 loss.
    """
    assert pred.shape == gt.shape
    total = math.prod(pred.shape)

    pred_flat = pred.reshape(-1)
    gt_flat = gt.reshape(-1)

    # Lane-dense, zero-copy flattening: widest L with rows = total/L a multiple
    # of 8, so no HBM pad copy is ever issued on the common path.
    L = None
    for cand in (512, 256, 128):
        if total % (8 * cand) == 0:
            L = cand
            break
    if L is None:
        # TODO(synk): fully-ragged sizes still pay one XLA pad copy; an
        # element-level in-kernel tail mask would remove it.
        L = 128
        padded_total = _round_up(total, 8 * L)
        pad = padded_total - total
        pred_flat = jnp.pad(pred_flat, (0, pad))
        gt_flat = jnp.pad(gt_flat, (0, pad))
    else:
        padded_total = total

    rows = padded_total // L
    pred2d = pred_flat.reshape(rows, L)     # zero-copy view of contiguous data
    gt2d = gt_flat.reshape(rows, L)

    # ~4 MiB (f32) per operand per block; 2 operands x 2 pipeline buffers fits
    # the 32 MiB scoped VMEM limit below on every chip (incl. v7x's 64 MiB).
    target_rows = max(8, (target_block_bytes // 4 // L) // 8 * 8)
    block_rows = min(rows, target_rows)

    row_blocks = -(-rows // block_rows)                      # cdiv
    num_slices = num_slices if row_blocks >= num_slices else 1
    blocks_per_slice = -(-row_blocks // num_slices)          # cdiv
    needs_mask = (num_slices * blocks_per_slice * block_rows) != rows
    last_block = row_blocks - 1

    def in_index_map(c, i):
        # Clamp so an over-covering tail step re-reads the last valid block
        # (its contribution is zeroed by the in-kernel validity mask).
        return (jnp.minimum(c * blocks_per_slice + i, last_block), 0)

    kernel = functools.partial(
        _focal_loss_kernel,
        rows=rows,
        block_rows=block_rows,
        blocks_per_slice=blocks_per_slice,
        needs_mask=needs_mask,
    )

    itemsize = jnp.dtype(pred.dtype).itemsize
    out = pl.pallas_call(
        kernel,
        out_shape=jax.ShapeDtypeStruct((num_slices, 8, 128), jnp.float32),
        grid_spec=pltpu.PrefetchScalarGridSpec(
            num_scalar_prefetch=0,
            grid=(num_slices, blocks_per_slice),
            in_specs=[
                pl.BlockSpec((block_rows, L), in_index_map),
                pl.BlockSpec((block_rows, L), in_index_map),
            ],
            # Leading dim squeezed -> kernel sees an (8, 128) slab per slice.
            out_specs=pl.BlockSpec((None, 8, 128), lambda c, i: (c, 0, 0)),
            scratch_shapes=[
                pltpu.VMEM((8, L), jnp.float32),   # per-slice loss accumulator
                pltpu.VMEM((8, L), jnp.float32),   # per-slice #pos accumulator
            ],
        ),
        compiler_params=pltpu.CompilerParams(
            dimension_semantics=("parallel", "arbitrary"),
            vmem_limit_bytes=32 * 1024 * 1024,
        ),
        cost_estimate=pl.CostEstimate(
            flops=20 * total,
            transcendentals=2 * total,
            bytes_accessed=2 * total * itemsize,
        ),
    )(pred2d, gt2d)

    loss_sum = jnp.sum(out[:, 0, 0])
    num_pos = jnp.sum(out[:, 0, 1])
    # num_pos == 0 => positive part is identically zero, so -loss_sum is the
    # pure negative loss, matching the PyTorch branch.
    return jnp.where(num_pos == 0.0, -loss_sum, -loss_sum / num_pos)


def _focal_loss_ref(pred, gt):
    """Pure-JAX reference mirroring the PyTorch _neg_loss."""
    pred = pred.astype(jnp.float32)
    gt = gt.astype(jnp.float32)
    pos_inds = (gt == 1.0).astype(jnp.float32)
    neg_inds = (gt < 1.0).astype(jnp.float32)
    neg_weights = jnp.power(1.0 - gt, 4.0)
    pos_loss = jnp.log(pred) * jnp.power(1.0 - pred, 2.0) * pos_inds
    neg_loss = jnp.log(1.0 - pred) * jnp.power(pred, 2.0) * neg_weights * neg_inds
    num_pos = pos_inds.sum()
    pos_sum = pos_loss.sum()
    neg_sum = neg_loss.sum()
    return jnp.where(num_pos == 0.0, -neg_sum, -(pos_sum + neg_sum) / num_pos)


if __name__ == "__main__":
    key = jax.random.PRNGKey(0)
    k1, k2 = jax.random.split(key)

    N, C, H, W = 2, 4, 16, 16

    # pred: sigmoid-like predictions strictly inside (0, 1)
    pred = jax.nn.sigmoid(jax.random.normal(k1, (N, C, H, W), jnp.float32))
    # gt: Gaussian-style heatmap in [0, 1] with a few exact 1.0 peaks
    gt = jax.nn.sigmoid(jax.random.normal(k2, (N, C, H, W), jnp.float32)) * 0.9
    gt = gt.at[:, :, 4, 4].set(1.0)
    gt = gt.at[:, :, 10, 7].set(1.0)

    loss = jax.block_until_ready(focal_loss(pred, gt))
    ref = jax.block_until_ready(_focal_loss_ref(pred, gt))
    assert jnp.allclose(loss, ref, rtol=1e-5, atol=1e-5), (loss, ref)

    print("KERNEL_OK")
</pallas_src>

<mosaic_0001>
module attributes {stable_mosaic.version = 11 : i64} {
  func.func @_focal_loss_kernel(%arg0: i32, %arg1: i32, %arg2: memref<8x256xf32, #tpu.memory_space<vmem>>, %arg3: memref<8x256xf32, #tpu.memory_space<vmem>>, %arg4: memref<1x8x128xf32, #tpu.memory_space<vmem>>, %arg5: memref<8x256xf32, #tpu.memory_space<vmem>>, %arg6: memref<8x256xf32, #tpu.memory_space<vmem>>) attributes {dimension_semantics = [#tpu.dimension_semantics<parallel>, #tpu.dimension_semantics<arbitrary>], iteration_bounds = array<i64: 1, 1>, scalar_prefetch = 0 : i64, scratch_operands = 2 : i64, tpu.core_type = #tpu.core_type<tc>, window_params = [{transform_indices = @transform_0, window_bounds = array<i64: 8, 256>}, {transform_indices = @transform_1, window_bounds = array<i64: 8, 256>}, {transform_indices = @transform_2, window_bounds = array<i64: 1, 8, 128>}]} {
    %c0_i32 = arith.constant 0 : i32
    %0 = arith.cmpi eq, %arg1, %c0_i32 : i32
    %1 = arith.extui %0 : i1 to i32
    %c0_i32_0 = arith.constant 0 : i32
    %2 = arith.cmpi ne, %1, %c0_i32_0 : i32
    scf.if %2 {
      %cst_20 = arith.constant 0.000000e+00 : f32
      %37 = vector.broadcast %cst_20 : f32 to vector<8x256xf32>
      %c0_21 = arith.constant 0 : index
      %c0_22 = arith.constant 0 : index
      %38 = vector.load %arg5[%c0_21, %c0_22] : memref<8x256xf32, #tpu.memory_space<vmem>>, vector<8x256xf32>
      tpu.vector_store %arg5[%c0_21, %c0_22], %37 {strides = array<i32>} : memref<8x256xf32, #tpu.memory_space<vmem>>, vector<8x256xf32>,
      %cst_23 = arith.constant 0.000000e+00 : f32
      %39 = vector.broadcast %cst_23 : f32 to vector<8x256xf32>
      %c0_24 = arith.constant 0 : index
      %c0_25 = arith.constant 0 : index
      %40 = vector.load %arg6[%c0_24, %c0_25] : memref<8x256xf32, #tpu.memory_space<vmem>>, vector<8x256xf32>
      tpu.vector_store %arg6[%c0_24, %c0_25], %39 {strides = array<i32>} : memref<8x256xf32, #tpu.memory_space<vmem>>, vector<8x256xf32>,
    } else {
    }
    %c0 = arith.constant 0 : index
    %c0_1 = arith.constant 0 : index
    %3 = vector.load %arg2[%c0, %c0_1] : memref<8x256xf32, #tpu.memory_space<vmem>>, vector<8x256xf32>
    %c0_2 = arith.constant 0 : index
    %c0_3 = arith.constant 0 : index
    %4 = vector.load %arg3[%c0_2, %c0_3] : memref<8x256xf32, #tpu.memory_space<vmem>>, vector<8x256xf32>
    %cst = arith.constant 1.000000e+00 : f32
    %5 = vector.broadcast %cst : f32 to vector<8x256xf32>
    %6 = arith.cmpf oeq, %4, %5 : vector<8x256xf32>
    %cst_4 = arith.constant 1.000000e+00 : f32
    %7 = vector.broadcast %cst_4 : f32 to vector<8x256xf32>
    %8 = arith.subf %7, %3 : vector<8x256xf32>
    %cst_5 = arith.constant 1.000000e+00 : f32
    %9 = vector.broadcast %cst_5 : f32 to vector<8x256xf32>
    %10 = arith.subf %9, %4 : vector<8x256xf32>
    %11 = arith.mulf %10, %10 : vector<8x256xf32>
    %12 = arith.mulf %11, %11 : vector<8x256xf32>
    %13 = math.log %3 : vector<8x256xf32>
    %14 = arith.mulf %8, %8 : vector<8x256xf32>
    %15 = arith.mulf %13, %14 : vector<8x256xf32>
    %16 = math.log %8 : vector<8x256xf32>
    %17 = arith.mulf %3, %3 : vector<8x256xf32>
    %18 = arith.mulf %16, %17 : vector<8x256xf32>
    %19 = arith.mulf %18, %12 : vector<8x256xf32>
    %20 = arith.select %6, %15, %19 : vector<8x256xi1>, vector<8x256xf32>
    %c0_6 = arith.constant 0 : index
    %c0_7 = arith.constant 0 : index
    %21 = vector.load %arg5[%c0_6, %c0_7] : memref<8x256xf32, #tpu.memory_space<vmem>>, vector<8x256xf32>
    %22 = vector.shape_cast %20 : vector<8x256xf32> to vector<1x8x256xf32>
    %cst_8 = arith.constant dense<0.000000e+00> : vector<8x256xf32>
    %23 = vector.multi_reduction <add>, %22, %cst_8 [0] : vector<1x8x256xf32> to vector<8x256xf32>
    %24 = arith.addf %21, %23 : vector<8x256xf32>
    %c0_9 = arith.constant 0 : index
    %c0_10 = arith.constant 0 : index
    %25 = vector.load %arg5[%c0_9, %c0_10] : memref<8x256xf32, #tpu.memory_space<vmem>>, vector<8x256xf32>
    tpu.vector_store %arg5[%c0_9, %c0_10], %24 {strides = array<i32>} : memref<8x256xf32, #tpu.memory_space<vmem>>, vector<8x256xf32>,
    %c0_11 = arith.constant 0 : index
    %c0_12 = arith.constant 0 : index
    %26 = vector.load %arg6[%c0_11, %c0_12] : memref<8x256xf32, #tpu.memory_space<vmem>>, vector<8x256xf32>
    %cst_13 = arith.constant 1.000000e+00 : f32
    %cst_14 = arith.constant 0.000000e+00 : f32
    %27 = vector.broadcast %cst_13 : f32 to vector<8x256xf32>
    %28 = vector.broadcast %cst_14 : f32 to vector<8x256xf32>
    %29 = arith.select %6, %27, %28 : vector<8x256xi1>, vector<8x256xf32>
    %30 = vector.shape_cast %29 : vector<8x256xf32> to vector<1x8x256xf32>
    %cst_15 = arith.constant dense<0.000000e+00> : vector<8x256xf32>
    %31 = vector.multi_reduction <add>, %30, %cst_15 [0] : vector<1x8x256xf32> to vector<8x256xf32>
    %32 = arith.addf %26, %31 : vector<8x256xf32>
    %c0_16 = arith.constant 0 : index
    %c0_17 = arith.constant 0 : index
    %33 = vector.load %arg6[%c0_16, %c0_17] : memref<8x256xf32, #tpu.memory_space<vmem>>, vector<8x256xf32>
    tpu.vector_store %arg6[%c0_16, %c0_17], %32 {strides = array<i32>} : memref<8x256xf32, #tpu.memory_space<vmem>>, vector<8x256xf32>,
    %c0_i32_18 = arith.constant 0 : i32
    %34 = arith.cmpi eq, %arg1, %c0_i32_18 : i32
    %35 = arith.extui %34 : i1 to i32
    %c0_i32_19 = arith.constant 0 : i32
    %36 = arith.cmpi ne, %35, %c0_i32_19 : i32
    scf.if %36 {
      %c0_20 = arith.constant 0 : index
      %c0_21 = arith.constant 0 : index
      %37 = vector.load %arg5[%c0_20, %c0_21] : memref<8x256xf32, #tpu.memory_space<vmem>>, vector<8x256xf32>
      %38 = vector.shape_cast %37 : vector<8x256xf32> to vector<1x8x256xf32>
      %cst_22 = arith.constant dense<0.000000e+00> : vector<1xf32>
      %39 = vector.multi_reduction <add>, %38, %cst_22 [1, 2] : vector<1x8x256xf32> to vector<1xf32>
      %40 = vector.shape_cast %39 : vector<1xf32> to vector<1x1x1xf32>
      %41 = vector.extract %40[0, 0, 0] : f32 from vector<1x1x1xf32>
      %c0_23 = arith.constant 0 : index
      %c0_24 = arith.constant 0 : index
      %42 = vector.load %arg6[%c0_23, %c0_24] : memref<8x256xf32, #tpu.memory_space<vmem>>, vector<8x256xf32>
      %43 = vector.shape_cast %42 : vector<8x256xf32> to vector<1x8x256xf32>
      %cst_25 = arith.constant dense<0.000000e+00> : vector<1xf32>
      %44 = vector.multi_reduction <add>, %43, %cst_25 [1, 2] : vector<1x8x256xf32> to vector<1xf32>
      %45 = vector.shape_cast %44 : vector<1xf32> to vector<1x1x1xf32>
      %46 = vector.extract %45[0, 0, 0] : f32 from vector<1x1x1xf32>
      %47 = tpu.iota {dimensions = array<i32: 0>} : vector<8x128xi32>
      %48 = tpu.iota {dimensions = array<i32: 1>} : vector<8x128xi32>
      %c0_i32_26 = arith.constant 0 : i32
      %49 = vector.broadcast %c0_i32_26 : i32 to vector<8x128xi32>
      %50 = arith.cmpi eq, %47, %49 : vector<8x128xi32>
      %c0_i32_27 = arith.constant 0 : i32
      %51 = vector.broadcast %c0_i32_27 : i32 to vector<8x128xi32>
      %52 = arith.cmpi eq, %48, %51 : vector<8x128xi32>
      %c1_i32 = arith.constant 1 : i32
      %53 = vector.broadcast %c1_i32 : i32 to vector<8x128xi32>
      %54 = arith.cmpi eq, %48, %53 : vector<8x128xi32>
      %cst_28 = arith.constant 0.000000e+00 : f32
      %55 = vector.broadcast %46 : f32 to vector<8x128xf32>
      %56 = vector.broadcast %cst_28 : f32 to vector<8x128xf32>
      %57 = arith.select %54, %55, %56 : vector<8x128xi1>, vector<8x128xf32>
      %58 = vector.broadcast %41 : f32 to vector<8x128xf32>
      %59 = arith.select %52, %58, %57 : vector<8x128xi1>, vector<8x128xf32>
      %cst_29 = arith.constant 0.000000e+00 : f32
      %60 = vector.broadcast %cst_29 : f32 to vector<8x128xf32>
      %61 = arith.select %50, %59, %60 : vector<8x128xi1>, vector<8x128xf32>
      %c0_30 = arith.constant 0 : index
      %c0_31 = arith.constant 0 : index
      %c0_32 = arith.constant 0 : index
      %62 = vector.load %arg4[%c0_30, %c0_31, %c0_32] : memref<1x8x128xf32, #tpu.memory_space<vmem>>, vector<1x8x128xf32>
      %63 = vector.shape_cast %62 : vector<1x8x128xf32> to vector<8x128xf32>
      %64 = vector.shape_cast %61 : vector<8x128xf32> to vector<1x8x128xf32>
      tpu.vector_store %arg4[%c0_30, %c0_31, %c0_32], %64 {strides = array<i32>} : memref<1x8x128xf32, #tpu.memory_space<vmem>>, vector<1x8x128xf32>,
    } else {
    }
    return
  }
  func.func @transform_0(%arg0: i32, %arg1: i32) -> (i32, i32) {
    %c1_i32 = arith.constant 1 : i32
    %0 = arith.muli %arg0, %c1_i32 : i32
    %1 = arith.addi %0, %arg1 : i32
    %c0_i32 = arith.constant 0 : i32
    %2 = arith.minsi %1, %c0_i32 : i32
    %c0_i32_0 = arith.constant 0 : i32
    %c0_i32_1 = arith.constant 0 : i32
    return %2, %c0_i32_0 : i32, i32
  }
  func.func @transform_1(%arg0: i32, %arg1: i32) -> (i32, i32) {
    %c1_i32 = arith.constant 1 : i32
    %0 = arith.muli %arg0, %c1_i32 : i32
    %1 = arith.addi %0, %arg1 : i32
    %c0_i32 = arith.constant 0 : i32
    %2 = arith.minsi %1, %c0_i32 : i32
    %c0_i32_0 = arith.constant 0 : i32
    %c0_i32_1 = arith.constant 0 : i32
    return %2, %c0_i32_0 : i32, i32
  }
  func.func @transform_2(%arg0: i32, %arg1: i32) -> (i32, i32, i32) {
    %c0_i32 = arith.constant 0 : i32
    %c0_i32_0 = arith.constant 0 : i32
    %c0_i32_1 = arith.constant 0 : i32
    return %arg0, %c0_i32, %c0_i32_0 : i32, i32, i32
  }
}

</mosaic_0001>

<bundles_post_ra>
// kernel: tpu_custom_call.1
= control target key start
LH: loop header
LB: loop body
LE: loop exit
PB: predicated region body
PF: predicated region fallthrough
CT: control target
= control target key end

     0   :  { %7 = vsyncpa [#allocation5], 0  ;;  %s317_s0 = inlined_call_operand.hbm [shape: f32[8,256], index: 0, kind: input, shape index: {}]   ;;  %s318_s1 = inlined_call_operand.hbm [shape: f32[8,256], index: 1, kind: input, shape index: {}]   ;;  %s319_s2 = inlined_call_operand.hbm [shape: f32[1,8,128], index: 2, kind: output, shape index: {}]  }
   0x1   :  { %8 = vsyncpa [#allocation8], 0 }
   0x2   :  { %9 = vsyncpa [#allocation6], 0  ;;  %s262_s9 = smov [#allocation4]   ;;  %s263_s11 = smov [#allocation7]  }
   0x3   :  { %s22_s10 = sshll.u32 %s262_s9, 4  ;;  %s38_s12 = sshll.u32 %s263_s11, 4  ;;  %s23_s10 = int_to_ptr.vmem [resolvable:$true] %s22_s10  ;;  %s39_s12 = int_to_ptr.vmem [resolvable:$true] %s38_s12 }
   0x4   :  { %s190_s15 = scalar_lea.hbm %s317_s0, 256 }
   0x5   :  { %p191_p0 = scmp.ne.s32.totalorder %s317_s0, %s190_s15  ;;  %p194_p1 = scmp.lt.u32.totalorder %s190_s15, %s317_s0 }
   0x7   :  { %p196_p2 = pnand %p194_p1, %p191_p0 }
   0x9   :  { %199 = shalt.err (!%p196_p2)
}
   0xa   :  { %s200_s20 = scalar_lea.vmem %s23_s10, 256  ;;  %p205_p4 = scmp.lt.s32.totalorder %s23_s10, %s23_s10 }
   0xb   :  { %p201_p3 = scmp.ne.s32.totalorder %s23_s10, %s200_s20  ;;  %p206_p5 = scmp.lt.s32.totalorder %s200_s20, %s200_s20 }
   0xd   :  { %p207_p6 = por %p206_p5, %p205_p4 }
   0xf   :  { %p208_p7 = pnand %p207_p6, %p201_p3 }
  0x11   :  { %211 = shalt.err (!%p208_p7)
}
  0x12   :  { %25 = dma.hbm_to_vmem [thread:$0]  %s317_s0, 256, %s23_s10, [#allocation5]  }
  0x13   :  { %s212_s25 = scalar_lea.hbm %s318_s1, 256 }
  0x14   :  { %p213_p8 = scmp.ne.s32.totalorder %s318_s1, %s212_s25  ;;  %p216_p9 = scmp.lt.u32.totalorder %s212_s25, %s318_s1 }
  0x16   :  { %p218_p10 = pnand %p216_p9, %p213_p8 }
  0x18   :  { %221 = shalt.err (!%p218_p10)
}
  0x19   :  { %s222_s30 = scalar_lea.vmem %s39_s12, 256  ;;  %p227_p12 = scmp.lt.s32.totalorder %s39_s12, %s39_s12 }
  0x1a   :  { %p223_p11 = scmp.ne.s32.totalorder %s39_s12, %s222_s30  ;;  %p228_p13 = scmp.lt.s32.totalorder %s222_s30, %s222_s30 }
  0x1c   :  { %p229_p0 = por %p228_p13, %p227_p12 }
  0x1e   :  { %p230_p1 = pnand %p229_p0, %p223_p11 }
  0x20   :  { %233 = shalt.err (!%p230_p1)
}
  0x21   :  { %41 = dma.hbm_to_vmem [thread:$0]  %s318_s1, 256, %s39_s12, [#allocation8]  }
  0x22   :  { %256 = dma.done.wait [#allocation5], 256  }
  0x23   :  { %257 = vsyncadd [#allocation5], 4294967040 }
  0x24   :  { %258 = dma.done.wait [#allocation8], 256  }
  0x25   :  { %259 = vsyncadd [#allocation8], 4294967040  ;;  %v62_v0 = vld [vmem:[#allocation4] sm:$0xff]  ;;  %v63_v1 = vld [vmem:[#allocation4 + $0x8] sm:$0xff]  ;;  %v264_v32 = vmov 0.0   ;;  %v141_v51 = vlaneseq  ;;  %s265_s5 = smov [#allocation9]  }
  0x26   :  { %v68_v2 = vsub.f32 1.0, %v62_v0  ;;  %v69_v3 = vsub.f32 1.0, %v63_v1  ;;  %182 = vlog2.f32 %v62_v0  ;;  %v64_v4 = vld [vmem:[#allocation7] sm:$0xff]  ;;  %v65_v5 = vld [vmem:[#allocation7 + $0x8] sm:$0xff]  ;;  %v88_v14 = vmul.f32 %v62_v0, %v62_v0  ;;  %s160_s6 = sshll.u32 %s265_s5, 4  ;;  %s161_s6 = int_to_ptr.vmem [resolvable:$true] %s160_s6 }
  0x27   :  { %184 = vlog2.f32 %v63_v1  ;;  %v70_v6 = vsub.f32 1.0, %v64_v4  ;;  %v71_v7 = vsub.f32 1.0, %v65_v5  ;;  %v89_v18 = vmul.f32 %v63_v1, %v63_v1  ;;  %s234_s7 = scalar_lea.vmem %s161_s6, 128  ;;  %p239_p3 = scmp.lt.s32.totalorder %s161_s6, %s161_s6 }
  0x28   :  { %186 = vlog2.f32 %v68_v2  ;;  %v80_v13 = vmul.f32 %v68_v2, %v68_v2  ;;  %v81_v17 = vmul.f32 %v69_v3, %v69_v3  ;;  %vm66_vm0 = vcmp.eq.f32.partialorder %v64_v4, 1.0  ;;  %p235_p2 = scmp.ne.s32.totalorder %s161_s6, %s234_s7  ;;  %p240_p4 = scmp.lt.s32.totalorder %s234_s7, %s234_s7 }
  0x29   :  { %188 = vlog2.f32 %v69_v3  ;;  %v72_v8 = vmul.f32 %v70_v6, %v70_v6  ;;  %v73_v10 = vmul.f32 %v71_v7, %v71_v7  ;;  %vm67_vm1 = vcmp.eq.f32.partialorder %v65_v5, 1.0 }
  0x2a   :  { %v106_v33 = vsel %vm66_vm0, 1.0, %v264_v32  ;;  %v107_v34 = vsel %vm67_vm1, 1.0, %v264_v32  ;;  %v144_v52 = vand.u32 127, %v141_v51  ;;  %v142_v53 = vshrl.u32 %v141_v51, 7  ;;  %p241_p5 = por %p240_p4, %p239_p3 }
  0x2b   :  { %v74_v20 = vmul.f32 %v72_v8, %v72_v8  ;;  %v75_v22 = vmul.f32 %v73_v10, %v73_v10  ;;  %v131_v36 = vadd.f32 %v107_v34, %v106_v33 }
  0x2c   :  { %vm147_vm2 = vcmp.eq.s32.totalorder %v144_v52, 1  ;;  %vm146_vm3 = vcmp.eq.s32.totalorder %v144_v52, 0  ;;  %vm145_vm4 = vcmp.eq.s32.totalorder %v142_v53, 0  ;;  %p242_p6 = pnand %p241_p5, %p235_p2 }
  0x30   :  { %v183_v9 = vpop.eup %182 }
  0x31   :  { %v185_v11 = vpop.eup %184  ;;  %v77_v12 = vmul.f32 0.6931472, %v183_v9 }
  0x32   :  { %v187_v15 = vpop.eup %186  ;;  %v79_v16 = vmul.f32 0.6931472, %v185_v11 }
  0x33   :  { %v189_v19 = vpop.eup %188  ;;  %v85_v21 = vmul.f32 0.6931472, %v187_v15  ;;  %v82_v24 = vmul.f32 %v80_v13, %v77_v12 }
  0x34   :  { %v87_v23 = vmul.f32 0.6931472, %v189_v19  ;;  %v83_v26 = vmul.f32 %v81_v17, %v79_v16 }
  0x35   :  { %v90_v25 = vmul.f32 %v88_v14, %v85_v21 }
  0x36   :  { %v91_v27 = vmul.f32 %v89_v18, %v87_v23 }
  0x37   :  { %v92_v28 = vmul.f32 %v90_v25, %v74_v20 }
  0x38   :  { %v93_v29 = vmul.f32 %v91_v27, %v75_v22 }
  0x39   :  { %v94_v30 = vsel %vm66_vm0, %v82_v24, %v92_v28 }
  0x3a   :  { %v95_v31 = vsel %vm67_vm1, %v83_v26, %v93_v29 }
  0x3b   :  { %v119_v35 = vadd.f32 %v95_v31, %v94_v30 }
  0x3d   :  { %120 = vadd.xlane.f32.xlu0 %v119_v35 }
  0x41   :  { %132 = vadd.xlane.f32.xlu0 %v131_v36 }
  0xca   :  { %v121_v37 = vpop.xlane.xlu0 %120 }
  0xcb   :  { %v122_v38 = vrot.slane %v121_v37, 4 }
  0xcd   :  { %v123_v39 = vadd.f32 %v122_v38, %v121_v37 }
  0xce   :  { %v133_v40 = vpop.xlane.xlu0 %132 }
  0xcf   :  { %v124_v41 = vrot.slane %v123_v39, 2  ;;  %v134_v42 = vrot.slane %v133_v40, 4 }
  0xd1   :  { %v135_v43 = vadd.f32 %v134_v42, %v133_v40  ;;  %v125_v44 = vadd.f32 %v124_v41, %v123_v39 }
  0xd3   :  { %v136_v45 = vrot.slane %v135_v43, 2  ;;  %v126_v46 = vrot.slane %v125_v44, 1 }
  0xd5   :  { %v137_v47 = vadd.f32 %v136_v45, %v135_v43  ;;  %v127_v48 = vadd.f32 %v126_v46, %v125_v44 }
  0xd7   :  { %174 = vpush %v127_v48  ;;  %v138_v49 = vrot.slane %v137_v47, 1 }
  0xd9   :  { %v139_v50 = vadd.f32 %v138_v49, %v137_v47 }
  0xdb   :  { %176 = vpush %v139_v50 }
 0x108   :  { %s175_s1 = spop %174 }
 0x109   :  { %v150_v55 = vstv %s175_s1 }
 0x10c   :  { %s177_s4 = spop %176 }
 0x10d   :  { %v148_v54 = vstv %s177_s4 }
 0x10e   :  { %v149_v56 = vsel %vm147_vm2, %v148_v54, 0.0 }
 0x10f   :  { %v151_v57 = vsel %vm146_vm3, %v150_v55, %v149_v56 }
 0x110   :  { %v152_v58 = vsel %vm145_vm4, %v151_v57, 0.0 }
 0x111   :  { %153 = vst [vmem:[#allocation9] sm:$0xff] %v152_v58 }
 0x112   :  { %245 = shalt.err (!%p242_p6)
}
 0x113   :  { %s246_s10 = scalar_lea.hbm %s319_s2, 128 }
 0x114   :  { %p247_p7 = scmp.ne.s32.totalorder %s319_s2, %s246_s10  ;;  %p250_p8 = scmp.lt.u32.totalorder %s246_s10, %s319_s2 }
 0x116   :  { %p252_p9 = pnand %p250_p8, %p247_p7 }
 0x118   :  { %255 = shalt.err (!%p252_p9)
}
 0x119   :  { %163 = dma.vmem_to_hbm [thread:$0]  %s161_s6, 128, %s319_s2, [#allocation6]  }
 0x11a   :  { %260 = dma.done.wait [#allocation6], 128  }
 0x11b   :  { %261 = vsyncadd [#allocation6], 4294967168 }
 0x11c   :  { %167 = vsyncpa [#allocation5], 1 }
 0x11d   :  { %168 = vsyncpa [#allocation8], 1 }
 0x11e   :  { %169 = vsyncpa [#allocation6], 1 }

</bundles_post_ra>
